<compile_context>
chip_gen: v6e
topology: v6e:2x2x1
jax: 0.10.0
libtpu: 0.0.40
codegen_flags: <defaults>
</compile_context>

<pallas_src>
import functools

import numpy as np

import jax
import jax.numpy as jnp
from jax import lax
from jax.experimental import pallas as pl
from jax.experimental.pallas import tpu as pltpu


# ----------------------------- helpers / constants -----------------------------


def _round_up(x, m):
    return ((x + m - 1) // m) * m


def _hz_to_mel(f):
    # HTK mel scale (torchaudio default mel_scale="htk")
    return 2595.0 * np.log10(1.0 + f / 700.0)


def _mel_to_hz(m):
    return 700.0 * (10.0 ** (m / 2595.0) - 1.0)


def _melscale_fbanks_np(n_freqs, f_min, f_max, n_mels, sample_rate):
    """torchaudio.functional.melscale_fbanks (htk, norm=None): (n_freqs, n_mels)."""
    all_freqs = np.linspace(0.0, float(sample_rate // 2), n_freqs)
    m_pts = np.linspace(_hz_to_mel(f_min), _hz_to_mel(f_max), n_mels + 2)
    f_pts = _mel_to_hz(m_pts)                                  # (n_mels + 2,)
    f_diff = f_pts[1:] - f_pts[:-1]                            # (n_mels + 1,)
    slopes = f_pts[None, :] - all_freqs[:, None]               # (n_freqs, n_mels + 2)
    down = -slopes[:, :-2] / f_diff[:-1]
    up = slopes[:, 2:] / f_diff[1:]
    return np.maximum(0.0, np.minimum(down, up)).astype(np.float32)


def _packed_windowed_dft_np(n_fft, w_cols):
    """Hann-window-folded real-DFT basis, cos|sin packed contiguously.

    Columns [0, n_freqs) = win*cos, [n_freqs, 2*n_freqs) = win*sin, rest zero.
    Shape (n_fft, w_cols)."""
    n_freqs = n_fft // 2 + 1
    n = np.arange(n_fft, dtype=np.float64)
    k = np.arange(n_freqs, dtype=np.float64)
    ang = 2.0 * np.pi * n[:, None] * k[None, :] / float(n_fft)
    # torch.hann_window(n_fft, periodic=True)
    win = 0.5 * (1.0 - np.cos(2.0 * np.pi * n / float(n_fft)))
    basis = np.zeros((n_fft, w_cols), np.float64)
    basis[:, :n_freqs] = win[:, None] * np.cos(ang)
    basis[:, n_freqs:2 * n_freqs] = win[:, None] * np.sin(ang)  # sign irrelevant: power only
    return basis.astype(np.float32)


# --------------------------------- Pallas kernel --------------------------------


def _melspec_kernel(chunks_ref, bt_ref, bb_ref, fbt_ref, out_ref, *, precision):
    # chunks_ref: (TF + 1, hop)  hop-sized chunks of the padded signal(s)
    # bt_ref:     (hop, W)       window-folded DFT basis, rows [0, hop)
    # bb_ref:     (hop, W)       window-folded DFT basis, rows [hop, n_fft)
    # fbt_ref:    (NM, W)        row-stacked mel filterbank (transposed)
    # out_ref:    (NM, TF)       mel bins on sublanes, frame slots on lanes
    tf = out_ref.shape[-1]
    # Frame f = [chunk f | chunk f+1]; the DFT is linear, so contract the two
    # chunk halves against the two basis halves instead of assembling frames.
    c_lo = chunks_ref[pl.ds(0, tf), :]                 # chunk f
    c_hi = chunks_ref[pl.ds(1, tf), :]                 # chunk f + 1
    y = jnp.dot(c_lo, bt_ref[...],
                preferred_element_type=jnp.float32, precision=precision)
    y = y + jnp.dot(c_hi, bb_ref[...],
                    preferred_element_type=jnp.float32, precision=precision)
    power = y * y                                      # cos^2 | sin^2 halves (f32 VPU)
    # (NM, TF): mel on sublanes, frames on lanes -> narrow, lane-dense output
    # tiles.  The (TF, W) -> (W, TF) transpose rides the XLU under the MXU.
    out_ref[...] = lax.dot_general(
        fbt_ref[...], power,
        dimension_numbers=(((1,), (1,)), ((), ())),
        preferred_element_type=jnp.float32, precision=precision)


# ------------------------------------ wrapper ------------------------------------


@functools.partial(jax.jit, static_argnames=("sr", "n_fft", "n_mels", "precision"))
def mfcc_array_forward(X, *, sr, n_fft, n_mels, precision=None):
    """X: (batch, n_arrays, time_steps) float32.

    Returns (batch, n_arrays, n_mels, n_frames), matching the PyTorch module.
    `precision=jax.lax.Precision.HIGHEST` gives closest-to-torch f32 fidelity;
    the default accepts the MXU's default f32 path (faster)."""
    B, A, T = X.shape
    if n_fft % 2 != 0:
        raise ValueError("n_fft must be even (torchaudio default hop = n_fft // 2).")
    hop = n_fft // 2
    pad = n_fft // 2
    if T <= pad:
        raise ValueError(f"reflect padding requires time_steps > n_fft // 2 = {pad}.")

    n_freqs = n_fft // 2 + 1
    n_frames = 1 + T // hop
    n_chunks = n_frames + 1                 # hop-sized chunks per signal
    BA = B * A

    W = _round_up(2 * n_freqs, 128)         # packed cos|sin width (ONE 128-pad)
    NM = _round_up(n_mels, 8)               # mel rows live on sublanes

    # ---- glue: reflect pad + hop-chunking (no 2x frame matrix in HBM) ----
    x = X.reshape(BA, T).astype(jnp.float32)
    x_pad = jnp.pad(x, ((0, 0), (pad, pad)), mode="reflect")
    gchunks = x_pad[:, :n_chunks * hop].reshape(BA * n_chunks, hop)

    # One "frame slot" per global chunk g (frame slot g uses chunks g and g+1).
    # Slots at the end of each signal mix two signals; they are computed (cheap,
    # 1/n_chunks of the work) and sliced off after the kernel.
    total_slots = BA * n_chunks
    if total_slots <= 1024:
        TF = _round_up(total_slots, 8)      # single tile: no 128 constraint, no waste
        n_tiles = 1
    else:
        TF = 512                            # 512-row tiles amortize per-step overhead
        n_tiles = int(pl.cdiv(total_slots, TF))
    n_slots_pad = n_tiles * TF

    rows_needed = n_slots_pad + 1           # each tile reads TF + 1 chunks
    gchunks = jnp.pad(gchunks, ((0, rows_needed - total_slots), (0, 0)))
    if n_tiles == 1:
        tiled = gchunks[None]                                        # (1, TF+1, hop)
    else:
        # ~1 duplicated chunk per TF chunks (<0.5% extra HBM) buys fully standard,
        # non-overlapping BlockSpec tiles.
        tiled = jnp.stack(
            [gchunks[j * TF: j * TF + TF + 1] for j in range(n_tiles)], axis=0)

    # ---- host-built constants (baked into the graph once) ----
    basis = _packed_windowed_dft_np(n_fft, W)                        # (n_fft, W)
    bt = jnp.asarray(basis[:hop])                                    # (hop, W)
    bb = jnp.asarray(basis[hop:])                                    # (hop, W)
    fb = _melscale_fbanks_np(n_freqs, 0.0, float(sr // 2), n_mels, sr)
    fbt_np = np.zeros((NM, W), np.float32)
    fbt_np[:n_mels, :n_freqs] = fb.T                                 # cos^2 half
    fbt_np[:n_mels, n_freqs:2 * n_freqs] = fb.T                      # sin^2 half
    fbt = jnp.asarray(fbt_np)

    flops = n_slots_pad * (2 * n_fft * W + 2 * W + 2 * NM * W)
    bytes_accessed = 4 * (n_tiles * (TF + 1) * hop + n_fft * W + NM * W
                          + NM * n_slots_pad)

    kernel = functools.partial(_melspec_kernel, precision=precision)
    out = pl.pallas_call(
        kernel,
        out_shape=jax.ShapeDtypeStruct((NM, n_slots_pad), jnp.float32),
        grid_spec=pl.GridSpec(
            grid=(n_tiles,),
            in_specs=[
                pl.BlockSpec((None, TF + 1, hop), lambda i: (i, 0, 0)),
                pl.BlockSpec((hop, W), lambda i: (0, 0)),   # resident constants
                pl.BlockSpec((hop, W), lambda i: (0, 0)),
                pl.BlockSpec((NM, W), lambda i: (0, 0)),
            ],
            out_specs=pl.BlockSpec((NM, TF), lambda i: (0, i)),
        ),
        compiler_params=pltpu.CompilerParams(
            dimension_semantics=("parallel",),
            vmem_limit_bytes=40 * 1024 * 1024),
        cost_estimate=pl.CostEstimate(
            flops=int(flops), transcendentals=0, bytes_accessed=int(bytes_accessed)),
    )(tiled, bt, bb, fbt)

    # (NM, n_slots_pad) -> (B, A, n_mels, n_frames); drop padded mel rows,
    # padded slots, and the per-signal junk slot.
    mel = out[:n_mels, :total_slots].reshape(n_mels, BA, n_chunks)[:, :, :n_frames]
    mel = jnp.transpose(mel, (1, 0, 2)).reshape(B, A, n_mels, n_frames)
    return mel


# --------------------------------- self-test glue --------------------------------


def _reference_melspec(X, sr, n_fft, n_mels):
    """Pure-JAX rFFT-based MelSpectrogram reference (same defaults)."""
    B, A, T = X.shape
    hop = n_fft // 2
    n_frames = 1 + T // hop
    x = X.reshape(B * A, T).astype(jnp.float32)
    x_pad = jnp.pad(x, ((0, 0), (hop, hop)), mode="reflect")
    idx = jnp.arange(n_frames)[:, None] * hop + jnp.arange(n_fft)[None, :]
    frames = x_pad[:, idx]                                          # (BA, F, n_fft)
    win = 0.5 * (1.0 - jnp.cos(2.0 * jnp.pi * jnp.arange(n_fft) / n_fft))
    z = jnp.fft.rfft(frames * win, axis=-1)
    spec = z.real ** 2 + z.imag ** 2                                # (BA, F, n_freqs)
    fb = jnp.asarray(
        _melscale_fbanks_np(n_fft // 2 + 1, 0.0, float(sr // 2), n_mels, sr))
    mel = jnp.einsum("bfk,km->bmf", spec, fb)
    return mel.reshape(B, A, n_mels, n_frames)


def _check(name, *, sr, n_fft, n_mels, B, A, T, key):
    X = jax.random.normal(key, (B, A, T), dtype=jnp.float32)
    out = mfcc_array_forward(X, sr=sr, n_fft=n_fft, n_mels=n_mels)
    out = jax.block_until_ready(out)
    n_frames = 1 + T // (n_fft // 2)
    assert out.shape == (B, A, n_mels, n_frames), (name, out.shape)
    assert out.dtype == jnp.float32, name
    assert bool(jnp.all(jnp.isfinite(out))), name
    ref = _reference_melspec(X, sr, n_fft, n_mels)
    err = float(jnp.max(jnp.abs(out - ref)) / (jnp.max(jnp.abs(ref)) + 1e-6))
    assert err < 5e-2, (name, err)


if __name__ == "__main__":
    key = jax.random.PRNGKey(0)
    k1, k2 = jax.random.split(key)
    # Small config consistent with the module (exercises the single-tile path).
    _check("small", sr=16000, n_fft=64, n_mels=16, B=2, A=4, T=256, key=k1)
    # Longer signals / padded n_mels (exercises the multi-tile, padded-slot path).
    _check("multi_tile", sr=24000, n_fft=128, n_mels=20, B=2, A=4, T=8192, key=k2)
    print("KERNEL_OK")
</pallas_src>

<mosaic_0001>
module attributes {stable_mosaic.version = 11 : i64} {
  func.func @_melspec_kernel(%arg0: i32, %arg1: memref<1x81x32xf32, #tpu.memory_space<vmem>>, %arg2: memref<32x128xf32, #tpu.memory_space<vmem>>, %arg3: memref<32x128xf32, #tpu.memory_space<vmem>>, %arg4: memref<16x128xf32, #tpu.memory_space<vmem>>, %arg5: memref<16x80xf32, #tpu.memory_space<vmem>>) attributes {dimension_semantics = [#tpu.dimension_semantics<parallel>], iteration_bounds = array<i64: 1>, scalar_prefetch = 0 : i64, scratch_operands = 0 : i64, tpu.core_type = #tpu.core_type<tc>, window_params = [{transform_indices = @transform_0, window_bounds = array<i64: 1, 81, 32>}, {pipeline_mode = #tpu.pipeline_mode<synchronous>, transform_indices = @transform_1, window_bounds = array<i64: 32, 128>}, {pipeline_mode = #tpu.pipeline_mode<synchronous>, transform_indices = @transform_2, window_bounds = array<i64: 32, 128>}, {pipeline_mode = #tpu.pipeline_mode<synchronous>, transform_indices = @transform_3, window_bounds = array<i64: 16, 128>}, {transform_indices = @transform_4, window_bounds = array<i64: 16, 80>}]} {
    %c0 = arith.constant 0 : index
    %c0_0 = arith.constant 0 : index
    %c0_1 = arith.constant 0 : index
    %0 = vector.load %arg1[%c0, %c0_0, %c0_1] : memref<1x81x32xf32, #tpu.memory_space<vmem>>, vector<1x80x32xf32>
    %1 = vector.shape_cast %0 : vector<1x80x32xf32> to vector<80x32xf32>
    %c0_2 = arith.constant 0 : index
    %c1 = arith.constant 1 : index
    %c0_3 = arith.constant 0 : index
    %2 = vector.load %arg1[%c0_2, %c1, %c0_3] : memref<1x81x32xf32, #tpu.memory_space<vmem>>, vector<1x80x32xf32>
    %3 = vector.shape_cast %2 : vector<1x80x32xf32> to vector<80x32xf32>
    %c0_4 = arith.constant 0 : index
    %c0_5 = arith.constant 0 : index
    %4 = vector.load %arg2[%c0_4, %c0_5] : memref<32x128xf32, #tpu.memory_space<vmem>>, vector<32x128xf32>
    %cst = arith.constant dense<0.000000e+00> : vector<80x128xf32>
    %5 = tpu.matmul %1, %4, %cst {dimension_numbers = #tpu.dot_dimension_numbers<[1], [0], [0], [1], [0, 0, 1, 1], [], []>} : vector<80x32xf32>, vector<32x128xf32>, vector<80x128xf32> -> vector<80x128xf32>
    %c0_6 = arith.constant 0 : index
    %c0_7 = arith.constant 0 : index
    %6 = vector.load %arg3[%c0_6, %c0_7] : memref<32x128xf32, #tpu.memory_space<vmem>>, vector<32x128xf32>
    %cst_8 = arith.constant dense<0.000000e+00> : vector<80x128xf32>
    %7 = tpu.matmul %3, %6, %cst_8 {dimension_numbers = #tpu.dot_dimension_numbers<[1], [0], [0], [1], [0, 0, 1, 1], [], []>} : vector<80x32xf32>, vector<32x128xf32>, vector<80x128xf32> -> vector<80x128xf32>
    %8 = arith.addf %5, %7 : vector<80x128xf32>
    %9 = arith.mulf %8, %8 : vector<80x128xf32>
    %c0_9 = arith.constant 0 : index
    %c0_10 = arith.constant 0 : index
    %10 = vector.load %arg4[%c0_9, %c0_10] : memref<16x128xf32, #tpu.memory_space<vmem>>, vector<16x128xf32>
    %cst_11 = arith.constant dense<0.000000e+00> : vector<16x80xf32>
    %11 = tpu.matmul %10, %9, %cst_11 {dimension_numbers = #tpu.dot_dimension_numbers<[1], [1], [0], [0], [0, 0, 1, 0], [], []>} : vector<16x128xf32>, vector<80x128xf32>, vector<16x80xf32> -> vector<16x80xf32>
    %c0_12 = arith.constant 0 : index
    %c0_13 = arith.constant 0 : index
    %12 = vector.load %arg5[%c0_12, %c0_13] : memref<16x80xf32, #tpu.memory_space<vmem>>, vector<16x80xf32>
    tpu.vector_store %arg5[%c0_12, %c0_13], %11 {strides = array<i32>} : memref<16x80xf32, #tpu.memory_space<vmem>>, vector<16x80xf32>,
    return
  }
  func.func @transform_0(%arg0: i32) -> (i32, i32, i32) {
    %c0_i32 = arith.constant 0 : i32
    %c0_i32_0 = arith.constant 0 : i32
    %c0_i32_1 = arith.constant 0 : i32
    return %arg0, %c0_i32, %c0_i32_0 : i32, i32, i32
  }
  func.func @transform_1(%arg0: i32) -> (i32, i32) {
    %c0_i32 = arith.constant 0 : i32
    %c0_i32_0 = arith.constant 0 : i32
    %c0_i32_1 = arith.constant 0 : i32
    return %c0_i32, %c0_i32_0 : i32, i32
  }
  func.func @transform_2(%arg0: i32) -> (i32, i32) {
    %c0_i32 = arith.constant 0 : i32
    %c0_i32_0 = arith.constant 0 : i32
    %c0_i32_1 = arith.constant 0 : i32
    return %c0_i32, %c0_i32_0 : i32, i32
  }
  func.func @transform_3(%arg0: i32) -> (i32, i32) {
    %c0_i32 = arith.constant 0 : i32
    %c0_i32_0 = arith.constant 0 : i32
    %c0_i32_1 = arith.constant 0 : i32
    return %c0_i32, %c0_i32_0 : i32, i32
  }
  func.func @transform_4(%arg0: i32) -> (i32, i32) {
    %c0_i32 = arith.constant 0 : i32
    %c0_i32_0 = arith.constant 0 : i32
    return %c0_i32, %arg0 : i32, i32
  }
}

</mosaic_0001>

<bundles_post_ra>
// kernel: mfcc_array_forward.1
= control target key start
LH: loop header
LB: loop body
LE: loop exit
PB: predicated region body
PF: predicated region fallthrough
CT: control target
= control target key end

     0   :  { %vm45_vm0 = vcmask 261120   ;;  %vm423_vm1 = vcmask 654336   ;;  %s700_s2 = inlined_call_operand.vmem [shape: f32[32,128], index: 2, kind: input, shape index: {}]   ;;  %s701_s0 = inlined_call_operand.vmem [shape: f32[1,81,32], index: 0, kind: input, shape index: {}]   ;;  %s702_s1 = inlined_call_operand.vmem [shape: f32[32,128], index: 1, kind: input, shape index: {}]   ;;  %s703_s3 = inlined_call_operand.vmem [shape: f32[16,128], index: 3, kind: input, shape index: {}]   ;;  %s704_s4 = inlined_call_operand.vmem [shape: f32[16,80], index: 4, kind: output, shape index: {}]  }
   0x1   :  { %v44_v0 = vld [vmem:[%s700_s2 + $0x18] sm:$0xff]  ;;  %v43_v1 = vld [vmem:[%s700_s2 + $0x10] sm:$0xff]  ;;  %v27_v2 = vld [vmem:[%s701_s0 + $0x1] sm:$0xff] }
   0x2   :  { %490 = vmatprep.subr.mxu1 %v44_v0  ;;  %v42_v3 = vld [vmem:[%s700_s2 + $0x8] sm:$0xff]  ;;  %498 = vmatprep.mubr.msk.f32.mxu1 %vm45_vm0, %v27_v2  ;;  %v41_v4 = vld [vmem:[%s700_s2] sm:$0xff]  ;;  %v40_v6 = vld [vmem:[%s702_s1 + $0x18] sm:$0xff] }
   0x3   :  { %491 = vmatpush3.msra.mxu1 %v44_v0  ;;  %v28_v5 = vld [vmem:[%s701_s0 + $0x9] sm:$0xff]  ;;  %v29_v7 = vld [vmem:[%s701_s0 + $0x11] sm:$0xff]  ;;  %v30_v9 = vld [vmem:[%s701_s0 + $0x19] sm:$0xff] }
   0x4   :  { %492 = vmatprep.subr.mxu1 %v43_v1  ;;  %v39_v8 = vld [vmem:[%s702_s1 + $0x10] sm:$0xff]  ;;  %v38_v10 = vld [vmem:[%s702_s1 + $0x8] sm:$0xff]  ;;  %v37_v12 = vld [vmem:[%s702_s1] sm:$0xff] }
   0x5   :  { %493 = vmatpush3.msra.mxu1 %v43_v1  ;;  %v31_v11 = vld [vmem:[%s701_s0 + $0x21] sm:$0xff]  ;;  %v32_v13 = vld [vmem:[%s701_s0 + $0x29] sm:$0xff]  ;;  %v33_v14 = vld [vmem:[%s701_s0 + $0x31] sm:$0xff] }
   0x6   :  { %494 = vmatprep.subr.mxu1 %v42_v3  ;;  %v34_v15 = vld [vmem:[%s701_s0 + $0x39] sm:$0xff]  ;;  %v35_v16 = vld [vmem:[%s701_s0 + $0x41] sm:$0xff]  ;;  %v36_v17 = vld [vmem:[%s701_s0 + $0x49] sm:$0xff] }
   0x7   :  { %495 = vmatpush3.msra.mxu1 %v42_v3  ;;  %v17_v18 = vld [vmem:[%s701_s0] sm:$0xff]  ;;  %v18_v19 = vld [vmem:[%s701_s0 + $0x8] sm:$0xff]  ;;  %v19_v20 = vld [vmem:[%s701_s0 + $0x10] sm:$0xff] }
   0x8   :  { %496 = vmatprep.subr.mxu1 %v41_v4  ;;  %v20_v21 = vld [vmem:[%s701_s0 + $0x18] sm:$0xff]  ;;  %v21_v22 = vld [vmem:[%s701_s0 + $0x20] sm:$0xff]  ;;  %v22_v23 = vld [vmem:[%s701_s0 + $0x28] sm:$0xff] }
   0x9   :  { %497 = vmatpush3.msra.mxu1 %v41_v4  ;;  %v23_v24 = vld [vmem:[%s701_s0 + $0x30] sm:$0xff]  ;;  %v24_v25 = vld [vmem:[%s701_s0 + $0x38] sm:$0xff]  ;;  %v25_v26 = vld [vmem:[%s701_s0 + $0x40] sm:$0xff] }
   0xa   :  { %499 = vmatmul.mubr.msk.f32.vlgmr.msra.gmra.mxu1 %vm45_vm0, %v28_v5  ;;  %513 = vmatprep.subr.mxu1 %v40_v6  ;;  %v26_v27 = vld [vmem:[%s701_s0 + $0x48] sm:$0xff]  ;;  %v346_v28 = vld [vmem:[%s703_s3] sm:$0xff] }
   0xb   :  { %514 = vmatpush3.msra.mxu1 %v40_v6  ;;  %501 = vmatprep.mubr.msk.f32.mxu1 %vm45_vm0, %v29_v7  ;;  %v347_v5 = vld [vmem:[%s703_s3 + $0x8] sm:$0xff] }
   0xc   :  { %515 = vmatprep.subr.mxu1 %v39_v8  ;;  %556 = vmatprep.mubr.f32.mxu0 %v346_v28 }
   0xd   :  { %516 = vmatpush3.msra.mxu1 %v39_v8 }
   0xe   :  { %502 = vmatmul.mubr.msk.f32.gmra.mxu1 %vm45_vm0, %v30_v9  ;;  %517 = vmatprep.subr.mxu1 %v38_v10 }
   0xf   :  { %504 = vmatprep.mubr.msk.f32.mxu1 %vm45_vm0, %v31_v11  ;;  %518 = vmatpush3.msra.mxu1 %v38_v10 }
  0x10   :  { %519 = vmatprep.subr.mxu1 %v37_v12 }
  0x11   :  { %520 = vmatpush3.msra.mxu1 %v37_v12 }
  0x12   :  { %505 = vmatmul.mubr.msk.f32.gmra.mxu1 %vm45_vm0, %v32_v13 }
  0x13   :  { %507 = vmatprep.mubr.msk.f32.mxu1 %vm45_vm0, %v33_v14 }
  0x16   :  { %508 = vmatmul.mubr.msk.f32.gmra.mxu1 %vm45_vm0, %v34_v15 }
  0x17   :  { %510 = vmatprep.mubr.msk.f32.mxu1 %vm45_vm0, %v35_v16 }
  0x1a   :  { %511 = vmatmul.mubr.msk.f32.gmra.mxu1 %vm45_vm0, %v36_v17 }
  0x1b   :  { %521 = vmatprep.mubr.msk.f32.mxu1 %vm45_vm0, %v17_v18 }
  0x1e   :  { %522 = vmatmul.mubr.msk.f32.vlgmr.msra.gmra.mxu1 %vm45_vm0, %v18_v19 }
  0x1f   :  { %524 = vmatprep.mubr.msk.f32.mxu1 %vm45_vm0, %v19_v20 }
  0x22   :  { %525 = vmatmul.mubr.msk.f32.gmra.mxu1 %vm45_vm0, %v20_v21 }
  0x23   :  { %527 = vmatprep.mubr.msk.f32.mxu1 %vm45_vm0, %v21_v22 }
  0x26   :  { %528 = vmatmul.mubr.msk.f32.gmra.mxu1 %vm45_vm0, %v22_v23 }
  0x27   :  { %530 = vmatprep.mubr.msk.f32.mxu1 %vm45_vm0, %v23_v24 }
  0x2a   :  { %531 = vmatmul.mubr.msk.f32.gmra.mxu1 %vm45_vm0, %v24_v25 }
  0x2b   :  { %533 = vmatprep.mubr.msk.f32.mxu1 %vm45_vm0, %v25_v26 }
  0x2e   :  { %534 = vmatmul.mubr.msk.f32.gmra.mxu1 %vm45_vm0, %v26_v27 }
  0xca   :  { %v500_v29 = vpop.f32.mrf.mxu1 }
  0xcc   :  { %v142_v30 = vpop.f32.mrf.mxu1 }
  0xce   :  { %v503_v31 = vpop.f32.mrf.mxu1 }
  0xd0   :  { %v152_v32 = vpop.f32.mrf.mxu1 }
  0xd2   :  { %v506_v33 = vpop.f32.mrf.mxu1 }
  0xd4   :  { %v162_v34 = vpop.f32.mrf.mxu1 }
  0xd6   :  { %v509_v35 = vpop.f32.mrf.mxu1 }
  0xd8   :  { %v172_v36 = vpop.f32.mrf.mxu1 }
  0xda   :  { %v512_v37 = vpop.f32.mrf.mxu1 }
  0xdc   :  { %v182_v38 = vpop.f32.mrf.mxu1 }
  0xde   :  { %v523_v39 = vpop.f32.mrf.mxu1 }
  0xdf   :  { %v293_v0 = vadd.f32 %v523_v39, %v500_v29 }
  0xe0   :  { %v287_v40 = vpop.f32.mrf.mxu1 }
  0xe1   :  { %v337_v2 = vmul.f32 %v293_v0, %v293_v0  ;;  %v288_v3 = vadd.f32 %v287_v40, %v142_v30 }
  0xe2   :  { %v526_v41 = vpop.f32.mrf.mxu1 }
  0xe3   :  { %v303_v60 = vadd.f32 %v526_v41, %v503_v31  ;;  %v336_v4 = vmul.f32 %v288_v3, %v288_v3 }
  0xe4   :  { %v297_v42 = vpop.f32.mrf.mxu1 }
  0xe5   :  { %v339_v62 = vmul.f32 %v303_v60, %v303_v60  ;;  %v298_v63 = vadd.f32 %v297_v42, %v152_v32 }
  0xe6   :  { %v529_v43 = vpop.f32.mrf.mxu1 }
  0xe7   :  { %v313_v56 = vadd.f32 %v529_v43, %v506_v33  ;;  %v338_v1 = vmul.f32 %v298_v63, %v298_v63 }
  0xe8   :  { %v307_v44 = vpop.f32.mrf.mxu1 }
  0xe9   :  { %v341_v58 = vmul.f32 %v313_v56, %v313_v56  ;;  %v308_v59 = vadd.f32 %v307_v44, %v162_v34 }
  0xea   :  { %v532_v45 = vpop.f32.mrf.mxu1 }
  0xeb   :  { %v323_v52 = vadd.f32 %v532_v45, %v509_v35  ;;  %v340_v61 = vmul.f32 %v308_v59, %v308_v59 }
  0xec   :  { %v317_v46 = vpop.f32.mrf.mxu1 }
  0xed   :  { %v343_v54 = vmul.f32 %v323_v52, %v323_v52  ;;  %v318_v55 = vadd.f32 %v317_v46, %v172_v36 }
  0xee   :  { %v535_v47 = vpop.f32.mrf.mxu1 }
  0xef   :  { %v333_v48 = vadd.f32 %v535_v47, %v512_v37  ;;  %v342_v57 = vmul.f32 %v318_v55, %v318_v55 }
  0xf0   :  { %v327_v49 = vpop.f32.mrf.mxu1 }
  0xf1   :  { %v345_v50 = vmul.f32 %v333_v48, %v333_v48  ;;  %v328_v51 = vadd.f32 %v327_v49, %v182_v38 }
  0xf3   :  { %v344_v53 = vmul.f32 %v328_v51, %v328_v51  ;;  %536 = vmatprep.subr.mxu0 %v345_v50 }
  0xf4   :  { %537 = vmatpush3.xpose.msra.mxu0 %v345_v50 }
  0xf5   :  { %538 = vmatprep.subr.mxu0 %v344_v53 }
  0xf8   :  { %539 = vmatpush3.xpose.msra.mxu0 %v344_v53 }
  0xf9   :  { %540 = vmatprep.subr.mxu0 %v343_v54 }
  0xfc   :  { %541 = vmatpush3.xpose.msra.mxu0 %v343_v54 }
  0xfd   :  { %542 = vmatprep.subr.mxu0 %v342_v57 }
 0x100   :  { %543 = vmatpush3.xpose.msra.mxu0 %v342_v57 }
 0x101   :  { %544 = vmatprep.subr.mxu0 %v341_v58 }
 0x104   :  { %545 = vmatpush3.xpose.msra.mxu0 %v341_v58 }
 0x105   :  { %546 = vmatprep.subr.mxu0 %v340_v61 }
 0x108   :  { %547 = vmatpush3.xpose.msra.mxu0 %v340_v61 }
 0x109   :  { %548 = vmatprep.subr.mxu0 %v339_v62 }
 0x10c   :  { %549 = vmatpush3.xpose.msra.mxu0 %v339_v62 }
 0x10d   :  { %550 = vmatprep.subr.mxu0 %v338_v1 }
 0x110   :  { %551 = vmatpush3.xpose.msra.mxu0 %v338_v1 }
 0x111   :  { %552 = vmatprep.subr.mxu0 %v337_v2 }
 0x114   :  { %553 = vmatpush3.xpose.msra.mxu0 %v337_v2 }
 0x115   :  { %554 = vmatprep.subr.mxu0 %v336_v4 }
 0x118   :  { %555 = vmatpush3.xpose.msra.mxu0 %v336_v4 }
 0x11b   :  { %557 = vmatmul.mubr.f32.vlgmr.msra.gmra.mxu0 %v347_v5 }
 0x1db   :  { %v558_v6 = vpop.f32.mrf.mxu0 }
 0x1dc   :  { %425 = vst.msk [vmem:[%s704_s4 + $0x8] sm:$0xff] %vm423_vm1, %v558_v6 }
 0x1dd   :  { %v414_v7 = vpop.f32.mrf.mxu0 }
 0x1de   :  { %424 = vst.msk [vmem:[%s704_s4] sm:$0xff] %vm423_vm1, %v414_v7 }

</bundles_post_ra>
